<compile_context>
chip_gen: v7x
topology: tpu7x:2x2x1
jax: 0.10.0
libtpu: 0.0.40
codegen_flags: <defaults>
</compile_context>

<pallas_src>
import functools

import numpy as np

import jax
import jax.numpy as jnp
from jax.experimental import pallas as pl
from jax.experimental.pallas import tpu as pltpu


# ----------------------------------------------------------------------------
# Kernel: fused QKV projection (+bias) and RoPE for one (row tile, head group).
# ----------------------------------------------------------------------------
def _qkv_rope_kernel(x_ref, w_ref, b_ref, rope_ref, q_ref, k_ref, v_ref, *,
                     head_dim, heads_per_group):
    hd, g = head_dim, heads_per_group
    tn = g * hd

    # One MXU pass per (row tile, head group): (tm, H) @ (H, 3*tn), f32 acc.
    qkv = jnp.dot(x_ref[...], w_ref[...], preferred_element_type=jnp.float32)
    qkv = qkv + b_ref[...].astype(jnp.float32)                       # (tm, 3*tn)

    q = qkv[:, 0 * tn:1 * tn]
    k = qkv[:, 1 * tn:2 * tn]
    v = qkv[:, 2 * tn:3 * tn]

    # Packed per-head RoPE rows -> broadcast across the group's heads (lane tile).
    rope = rope_ref[...].astype(jnp.float32)                         # (tm, 4*hd)
    cos_q = jnp.tile(rope[:, 0 * hd:1 * hd], (1, g))
    sin_q = jnp.tile(rope[:, 1 * hd:2 * hd], (1, g))
    cos_k = jnp.tile(rope[:, 2 * hd:3 * hd], (1, g))
    sin_k = jnp.tile(rope[:, 3 * hd:4 * hd], (1, g))

    # Half-major (within group) layout: rotate_half == lane roll by tn//2 (XLU);
    # the -/+ sign of rotate_half is a cheap VPU select folded into sin.
    lane = jax.lax.broadcasted_iota(jnp.int32, (1, tn), 1)
    sin_q = jnp.where(lane < tn // 2, -sin_q, sin_q)
    sin_k = jnp.where(lane < tn // 2, -sin_k, sin_k)

    shift = tn // 2
    q_ref[...] = (q * cos_q + pltpu.roll(q, shift=shift, axis=1) * sin_q
                  ).astype(q_ref.dtype)
    k_ref[...] = (k * cos_k + pltpu.roll(k, shift=shift, axis=1) * sin_k
                  ).astype(k_ref.dtype)
    v_ref[...] = v.astype(v_ref.dtype)


# ----------------------------------------------------------------------------
# One-time parameter preparation (weight-load time, not per forward).
# ----------------------------------------------------------------------------
def _group_column_perm(num_heads, head_dim, heads_per_group):
    """Per-group column index lists: half-major (for Q/K) and per-head (for V)."""
    half = head_dim // 2
    g = heads_per_group
    G = num_heads // g
    heads = np.arange(num_heads).reshape(G, g)
    base = heads[:, :, None] * head_dim                               # (G, g, 1)
    first = (base + np.arange(half)).reshape(G, g * half)
    half_major = np.concatenate([first, first + half], axis=1)        # (G, tn)
    per_head = (base + np.arange(head_dim)).reshape(G, g * head_dim)  # (G, tn)
    return half_major, per_head


def prepare_params(wq_t, bq, wk_t, bk, wv_t, bv, num_heads, heads_per_group=None):
    """Fuse Q/K/V into one weight/bias, grouped + column-permuted for the kernel.

    Column layout: [grp0: Q(half-major) K(half-major) V(per-head)] [grp1: ...].
    Weights are already transposed: (in, out).  Run once at weight-load time.
    """
    H = wq_t.shape[0]
    head_dim = H // num_heads
    assert head_dim % 2 == 0, "RoPE needs an even head_dim"
    g = heads_per_group or num_heads
    assert num_heads % g == 0
    hm, ph = _group_column_perm(num_heads, head_dim, g)
    G = num_heads // g
    w = jnp.concatenate(
        [jnp.concatenate([wq_t[:, hm[j]], wk_t[:, hm[j]], wv_t[:, ph[j]]], axis=1)
         for j in range(G)], axis=1)
    b = jnp.concatenate(
        [jnp.concatenate([bq[:, hm[j]], bk[:, hm[j]], bv[:, ph[j]]], axis=1)
         for j in range(G)], axis=1)
    return w, b                                                       # (H,3H),(1,3H)


def _rope_table(seq_len, q_offset, k_offset, head_dim, dtype=jnp.float32):
    """Packed per-head RoPE table (seq_len, 4*head_dim): [cos_q|sin_q|cos_k|sin_k].

    Each head_dim-wide block is the (seq, half) table repeated twice; the kernel
    tiles it across the heads of a group.  Production can store this in bf16.
    """
    half = head_dim // 2
    inv_freq = 1.0 / (10000.0 ** (jnp.arange(half, dtype=jnp.float32)
                                  * 2.0 / head_dim))
    pos = jnp.arange(seq_len, dtype=jnp.float32)

    def cs(offset):
        ang = (pos + float(offset))[:, None] * inv_freq[None, :]
        c, s = jnp.cos(ang), jnp.sin(ang)
        return jnp.concatenate([c, c], axis=1), jnp.concatenate([s, s], axis=1)

    cq, sq = cs(q_offset)
    ck, sk = cs(k_offset)
    return jnp.concatenate([cq, sq, ck, sk], axis=1).astype(dtype)


# ----------------------------------------------------------------------------
# Generation / VMEM aware tiling choices.
# ----------------------------------------------------------------------------
def _round_up(a, m):
    return -(-a // m) * m


def _pick_vmem_limit_bytes():
    try:
        kind = jax.devices()[0].device_kind.lower()
    except Exception:
        return None
    if "v7" in kind:
        return 48 * 1024 * 1024            # 64 MiB physical per TC -> headroom
    if "v5" in kind or "v6" in kind:
        return 100 * 1024 * 1024           # 128 MiB physical
    return None                             # unknown generation: compiler default


def _pick_heads_per_group(num_heads, head_dim, hidden_dim, param_itemsize,
                          vmem_limit=None):
    """Largest head group whose (double-buffered) (H, 3*tn) weight block fits a
    fraction of VMEM; partial-width blocks are kept lane (128) aligned."""
    budget = (vmem_limit or 32 * 1024 * 1024) // 3
    choice = None
    for g in range(num_heads, 0, -1):
        if num_heads % g:
            continue
        tn = g * head_dim
        if g < num_heads and tn % 128:
            continue
        choice = g
        if 2 * hidden_dim * 3 * tn * param_itemsize <= budget:
            break
    return choice or num_heads


def _pick_row_tiling(batch, s_pad, max_rows):
    """Row-tile size.  Returns (tm, nb): nb == 0 -> tiles live inside one
    batch's (padded) sequence (tm | s_pad); nb > 0 -> each tile spans nb whole
    batches (decode / short sequences keep the MXU M dimension full)."""
    if s_pad >= 128:
        cands = [t for t in range(8, min(s_pad, max_rows) + 1, 8)
                 if s_pad % t == 0]
        aligned = [t for t in cands if t % 128 == 0]
        return (max(aligned) if aligned else max(cands)), 0
    nb = 1
    for n in range(1, batch + 1):
        if batch % n == 0 and n * s_pad <= max(max_rows, s_pad):
            nb = n
    return nb * s_pad, nb


# ----------------------------------------------------------------------------
# Forward wrapper (mirrors MultiHeadQKVCreator.forward).
# ----------------------------------------------------------------------------
@functools.partial(jax.jit,
                   static_argnames=("num_heads", "heads_per_group", "max_row_tile"))
def multi_head_qkv(x, cache_key, cache_value, w_qkv, b_qkv, *,
                   num_heads, heads_per_group=None, max_row_tile=512):
    B, S, H = x.shape
    cache_len = cache_key.shape[1]
    hd = H // num_heads
    half = hd // 2
    g = heads_per_group or num_heads
    assert num_heads % g == 0
    G = num_heads // g
    tn = g * hd

    vmem_limit = _pick_vmem_limit_bytes()

    # Row-tile cap from the VMEM budget (double-buffered x / rope / outputs next
    # to the double-buffered weight block).
    w_bytes = 2 * (H + 1) * 3 * tn * w_qkv.dtype.itemsize
    row_bytes = 2 * (H * x.dtype.itemsize + 4 * hd * 4 + 3 * tn * x.dtype.itemsize)
    budget = vmem_limit or 32 * 1024 * 1024
    row_cap = max(8, ((budget - w_bytes) // 2) // max(row_bytes, 1) // 8 * 8)
    max_rows = max(8, min(max_row_tile, row_cap))

    S_pad = _round_up(S, 8)
    tm, nb = _pick_row_tiling(B, S_pad, max_rows)
    if S_pad != S:
        x = jnp.pad(x, ((0, 0), (0, S_pad - S), (0, 0)))
    BS = B * S_pad
    x2d = x.reshape(BS, H)

    # Packed RoPE table (S_pad, 4*hd); in whole-batch-tile mode pre-tile it so
    # its block index is constant (resident in VMEM) and rows stay correct.
    rope = _rope_table(S_pad, 0, cache_len, hd)        # f32 (bf16 ok for prod)
    if nb:
        rope = jnp.tile(rope, (nb, 1))
    s_tiles = rope.shape[0] // tm

    x_spec = pl.BlockSpec((tm, H), lambda i, j: (i, 0))      # re-fetch skipped over j
    w_spec = pl.BlockSpec((H, 3 * tn), lambda i, j: (0, j))
    b_spec = pl.BlockSpec((1, 3 * tn), lambda i, j: (0, j))
    rope_spec = pl.BlockSpec((tm, 4 * hd), lambda i, j: (i % s_tiles, 0))
    out_spec = pl.BlockSpec((tm, tn), lambda i, j: (i, j))
    out = jax.ShapeDtypeStruct((BS, H), x.dtype)

    q2d, k2d, v2d = pl.pallas_call(
        functools.partial(_qkv_rope_kernel, head_dim=hd, heads_per_group=g),
        grid=(BS // tm, G),
        in_specs=[x_spec, w_spec, b_spec, rope_spec],
        out_specs=(out_spec, out_spec, out_spec),
        out_shape=(out, out, out),
        compiler_params=pltpu.CompilerParams(
            dimension_semantics=("parallel", "arbitrary"),
            vmem_limit_bytes=vmem_limit),
    )(x2d, w_qkv, b_qkv, rope)

    # Un-permute (group half-major -> per-head) folded into the head-split
    # transpose the module performs anyway; v is already in per-head layout.
    def split_heads_rot(t2d):
        t = t2d.reshape(B, S_pad, G, 2, g, half)
        t = t.transpose(0, 2, 4, 1, 3, 5).reshape(B, num_heads, S_pad, hd)
        return t[:, :, :S]

    q = split_heads_rot(q2d)
    k_new = split_heads_rot(k2d)
    v_new = v2d.reshape(B, S_pad, num_heads, hd)[:, :S].transpose(0, 2, 1, 3)

    # TODO(synk): alias a caller-owned cache buffer instead of concatenating.
    k = jnp.concatenate([cache_key.transpose(0, 2, 1, 3), k_new], axis=2)
    v = jnp.concatenate([cache_value.transpose(0, 2, 1, 3), v_new], axis=2)
    return q, k, v


# ----------------------------------------------------------------------------
# Pure-JAX reference (mirrors the PyTorch forward) for correctness checks.
# ----------------------------------------------------------------------------
def _reference(x, cache_key, cache_value, wq_t, bq, wk_t, bk, wv_t, bv,
               num_heads):
    B, S, H = x.shape
    cache_len = cache_key.shape[1]
    head_dim = H // num_heads
    half = head_dim // 2
    hp = jax.lax.Precision.HIGHEST

    def rope(t, offset):  # t: (B, S, NH, HD)
        pos = jnp.arange(S, dtype=jnp.float32) + float(offset)
        inv_freq = 1.0 / (10000.0 ** (jnp.arange(half, dtype=jnp.float32)
                                      * 2.0 / head_dim))
        ang = pos[:, None] * inv_freq[None, :]
        cos = jnp.concatenate([jnp.cos(ang)] * 2, -1)[None, :, None, :]
        sin = jnp.concatenate([jnp.sin(ang)] * 2, -1)[None, :, None, :]
        t1, t2 = t[..., :half], t[..., half:]
        t_rot = jnp.concatenate([-t2, t1], axis=-1)
        return t * cos + t_rot * sin

    q = jnp.dot(x, wq_t, precision=hp) + bq
    k = jnp.dot(x, wk_t, precision=hp) + bk
    v = jnp.dot(x, wv_t, precision=hp) + bv
    q = q.reshape(B, S, num_heads, head_dim)
    k = k.reshape(B, S, num_heads, head_dim)
    v = v.reshape(B, S, num_heads, head_dim)
    q = rope(q, 0).transpose(0, 2, 1, 3)
    k = rope(k, cache_len)
    k = jnp.concatenate([cache_key, k], axis=1).transpose(0, 2, 1, 3)
    v = jnp.concatenate([cache_value, v], axis=1).transpose(0, 2, 1, 3)
    return q, k, v


if __name__ == "__main__":
    NUM_HEADS, HEAD_DIM = 2, 128
    H = NUM_HEADS * HEAD_DIM
    CACHE_LEN = 4

    root = jax.random.PRNGKey(0)
    kw, kx = jax.random.split(root)
    kwq, kbq, kwk, kbk, kwv, kbv = jax.random.split(kw, 6)

    # nn.Linear(H, H): weight (out, in); y = x @ W.T + b.  Store W.T directly.
    scale = 1.0 / (H ** 0.5)
    wq_t = jax.random.normal(kwq, (H, H), jnp.float32) * scale
    bq = jax.random.normal(kbq, (1, H), jnp.float32) * scale
    wk_t = jax.random.normal(kwk, (H, H), jnp.float32) * scale
    bk = jax.random.normal(kbk, (1, H), jnp.float32) * scale
    wv_t = jax.random.normal(kwv, (H, H), jnp.float32) * scale
    bv = jax.random.normal(kbv, (1, H), jnp.float32) * scale

    g_auto = _pick_heads_per_group(NUM_HEADS, HEAD_DIM, H, 4,
                                   _pick_vmem_limit_bytes())

    # (B, S, heads_per_group, max_row_tile):
    #   decode (tile spans batches), N-tiled weights (G=2), ragged S (padding),
    #   multi-tile prefill (RoPE block index wraps).
    configs = [
        (2, 8, g_auto, 512),
        (2, 8, 1, 512),
        (2, 12, g_auto, 512),
        (2, 256, g_auto, 128),
    ]

    for ci, (B, S, hpg, max_rows) in enumerate(configs):
        kx, k1, k2, k3 = jax.random.split(kx, 4)
        x = jax.random.normal(k1, (B, S, H), jnp.float32)
        cache_k = jax.random.normal(k2, (B, CACHE_LEN, NUM_HEADS, HEAD_DIM),
                                    jnp.float32)
        cache_v = jax.random.normal(k3, (B, CACHE_LEN, NUM_HEADS, HEAD_DIM),
                                    jnp.float32)

        w_qkv, b_qkv = prepare_params(wq_t, bq, wk_t, bk, wv_t, bv,
                                      NUM_HEADS, heads_per_group=hpg)
        q, k, v = multi_head_qkv(x, cache_k, cache_v, w_qkv, b_qkv,
                                 num_heads=NUM_HEADS, heads_per_group=hpg,
                                 max_row_tile=max_rows)
        jax.block_until_ready((q, k, v))

        assert q.shape == (B, NUM_HEADS, S, HEAD_DIM)
        assert k.shape == (B, NUM_HEADS, S + CACHE_LEN, HEAD_DIM)
        assert v.shape == (B, NUM_HEADS, S + CACHE_LEN, HEAD_DIM)

        qr, kr, vr = _reference(x, cache_k, cache_v, wq_t, bq, wk_t, bk,
                                wv_t, bv, NUM_HEADS)
        assert jnp.allclose(q, qr, atol=1e-3, rtol=1e-3), f"q mismatch cfg {ci}"
        assert jnp.allclose(k, kr, atol=1e-3, rtol=1e-3), f"k mismatch cfg {ci}"
        assert jnp.allclose(v, vr, atol=1e-3, rtol=1e-3), f"v mismatch cfg {ci}"

    # --- bf16 production path: bf16 MXU inputs/outputs, f32 accumulation ------
    B, S = 2, 8
    kx, k1, k2, k3 = jax.random.split(kx, 4)
    x = jax.random.normal(k1, (B, S, H), jnp.float32)
    cache_k = jax.random.normal(k2, (B, CACHE_LEN, NUM_HEADS, HEAD_DIM), jnp.float32)
    cache_v = jax.random.normal(k3, (B, CACHE_LEN, NUM_HEADS, HEAD_DIM), jnp.float32)
    w_qkv, b_qkv = prepare_params(wq_t, bq, wk_t, bk, wv_t, bv,
                                  NUM_HEADS, heads_per_group=g_auto)
    bf = jnp.bfloat16
    q16, k16, v16 = multi_head_qkv(x.astype(bf), cache_k.astype(bf),
                                   cache_v.astype(bf), w_qkv.astype(bf),
                                   b_qkv.astype(bf), num_heads=NUM_HEADS,
                                   heads_per_group=g_auto)
    jax.block_until_ready((q16, k16, v16))
    qr, kr, vr = _reference(x, cache_k, cache_v, wq_t, bq, wk_t, bk, wv_t, bv,
                            NUM_HEADS)
    assert jnp.allclose(q16.astype(jnp.float32), qr, atol=1e-1, rtol=1e-1)
    assert jnp.allclose(k16.astype(jnp.float32), kr, atol=1e-1, rtol=1e-1)
    assert jnp.allclose(v16.astype(jnp.float32), vr, atol=1e-1, rtol=1e-1)

    print("KERNEL_OK")
</pallas_src>

<mosaic_0001>
module attributes {stable_mosaic.version = 11 : i64} {
  func.func @_qkv_rope_kernel(%arg0: i32, %arg1: i32, %arg2: memref<16x256xf32, #tpu.memory_space<vmem>>, %arg3: memref<256x768xf32, #tpu.memory_space<vmem>>, %arg4: memref<1x768xf32, #tpu.memory_space<vmem>>, %arg5: memref<16x512xf32, #tpu.memory_space<vmem>>, %arg6: memref<16x256xf32, #tpu.memory_space<vmem>>, %arg7: memref<16x256xf32, #tpu.memory_space<vmem>>, %arg8: memref<16x256xf32, #tpu.memory_space<vmem>>) attributes {dimension_semantics = [#tpu.dimension_semantics<parallel>, #tpu.dimension_semantics<arbitrary>], iteration_bounds = array<i64: 1, 1>, scalar_prefetch = 0 : i64, scratch_operands = 0 : i64, tpu.core_type = #tpu.core_type<tc>, window_params = [{transform_indices = @transform_0, window_bounds = array<i64: 16, 256>}, {transform_indices = @transform_1, window_bounds = array<i64: 256, 768>}, {transform_indices = @transform_2, window_bounds = array<i64: 1, 768>}, {transform_indices = @transform_3, window_bounds = array<i64: 16, 512>}, {transform_indices = @transform_4, window_bounds = array<i64: 16, 256>}, {transform_indices = @transform_5, window_bounds = array<i64: 16, 256>}, {transform_indices = @transform_6, window_bounds = array<i64: 16, 256>}]} {
    %c0 = arith.constant 0 : index
    %c0_0 = arith.constant 0 : index
    %0 = vector.load %arg2[%c0, %c0_0] : memref<16x256xf32, #tpu.memory_space<vmem>>, vector<16x256xf32>
    %c0_1 = arith.constant 0 : index
    %c0_2 = arith.constant 0 : index
    %1 = vector.load %arg3[%c0_1, %c0_2] : memref<256x768xf32, #tpu.memory_space<vmem>>, vector<256x768xf32>
    %cst = arith.constant dense<0.000000e+00> : vector<16x768xf32>
    %2 = tpu.matmul %0, %1, %cst {dimension_numbers = #tpu.dot_dimension_numbers<[1], [0], [0], [1], [0, 0, 1, 1], [], []>} : vector<16x256xf32>, vector<256x768xf32>, vector<16x768xf32> -> vector<16x768xf32>
    %c0_3 = arith.constant 0 : index
    %c0_4 = arith.constant 0 : index
    %3 = vector.load %arg4[%c0_3, %c0_4] : memref<1x768xf32, #tpu.memory_space<vmem>>, vector<1x768xf32>
    %4 = vector.broadcast %3 : vector<1x768xf32> to vector<16x768xf32>
    %5 = arith.addf %2, %4 : vector<16x768xf32>
    %6 = vector.extract_strided_slice %5 {offsets = [0, 0], sizes = [16, 256], strides = [1, 1]} : vector<16x768xf32> to vector<16x256xf32>
    %7 = vector.extract_strided_slice %5 {offsets = [0, 256], sizes = [16, 256], strides = [1, 1]} : vector<16x768xf32> to vector<16x256xf32>
    %8 = vector.extract_strided_slice %5 {offsets = [0, 512], sizes = [16, 256], strides = [1, 1]} : vector<16x768xf32> to vector<16x256xf32>
    %c0_5 = arith.constant 0 : index
    %c0_6 = arith.constant 0 : index
    %9 = vector.load %arg5[%c0_5, %c0_6] : memref<16x512xf32, #tpu.memory_space<vmem>>, vector<16x512xf32>
    %10 = vector.extract_strided_slice %9 {offsets = [0, 0], sizes = [16, 128], strides = [1, 1]} : vector<16x512xf32> to vector<16x128xf32>
    %11 = tpu.concatenate %10, %10 in 1 : vector<16x128xf32>, vector<16x128xf32> -> vector<16x256xf32>
    %12 = vector.extract_strided_slice %9 {offsets = [0, 128], sizes = [16, 128], strides = [1, 1]} : vector<16x512xf32> to vector<16x128xf32>
    %13 = tpu.concatenate %12, %12 in 1 : vector<16x128xf32>, vector<16x128xf32> -> vector<16x256xf32>
    %14 = vector.extract_strided_slice %9 {offsets = [0, 256], sizes = [16, 128], strides = [1, 1]} : vector<16x512xf32> to vector<16x128xf32>
    %15 = tpu.concatenate %14, %14 in 1 : vector<16x128xf32>, vector<16x128xf32> -> vector<16x256xf32>
    %16 = vector.extract_strided_slice %9 {offsets = [0, 384], sizes = [16, 128], strides = [1, 1]} : vector<16x512xf32> to vector<16x128xf32>
    %17 = tpu.concatenate %16, %16 in 1 : vector<16x128xf32>, vector<16x128xf32> -> vector<16x256xf32>
    %18 = tpu.iota {dimensions = array<i32: 1>} : vector<1x256xi32>
    %c128_i32 = arith.constant 128 : i32
    %19 = vector.broadcast %c128_i32 : i32 to vector<1x256xi32>
    %20 = arith.cmpi slt, %18, %19 : vector<1x256xi32>
    %cst_7 = arith.constant 0.000000e+00 : f32
    %21 = vector.broadcast %cst_7 : f32 to vector<16x256xf32>
    %22 = arith.subf %21, %13 : vector<16x256xf32>
    %23 = vector.shape_cast %20 : vector<1x256xi1> to vector<1x256xi1>
    %24 = vector.broadcast %23 : vector<1x256xi1> to vector<16x256xi1>
    %25 = arith.select %24, %22, %13 : vector<16x256xi1>, vector<16x256xf32>
    %c128_i32_8 = arith.constant 128 : i32
    %26 = vector.broadcast %c128_i32_8 : i32 to vector<1x256xi32>
    %27 = arith.cmpi slt, %18, %26 : vector<1x256xi32>
    %cst_9 = arith.constant 0.000000e+00 : f32
    %28 = vector.broadcast %cst_9 : f32 to vector<16x256xf32>
    %29 = arith.subf %28, %17 : vector<16x256xf32>
    %30 = vector.shape_cast %27 : vector<1x256xi1> to vector<1x256xi1>
    %31 = vector.broadcast %30 : vector<1x256xi1> to vector<16x256xi1>
    %32 = arith.select %31, %29, %17 : vector<16x256xi1>, vector<16x256xf32>
    %33 = arith.mulf %6, %11 : vector<16x256xf32>
    %c128_i32_10 = arith.constant 128 : i32
    %34 = tpu.dynamic_rotate %6 by %c128_i32_10 dim 1 : vector<16x256xf32>, i32 -> vector<16x256xf32>
    %35 = arith.mulf %34, %25 : vector<16x256xf32>
    %36 = arith.addf %33, %35 : vector<16x256xf32>
    %c0_11 = arith.constant 0 : index
    %c0_12 = arith.constant 0 : index
    %37 = vector.load %arg6[%c0_11, %c0_12] : memref<16x256xf32, #tpu.memory_space<vmem>>, vector<16x256xf32>
    tpu.vector_store %arg6[%c0_11, %c0_12], %36 {strides = array<i32>} : memref<16x256xf32, #tpu.memory_space<vmem>>, vector<16x256xf32>,
    %38 = arith.mulf %7, %15 : vector<16x256xf32>
    %c128_i32_13 = arith.constant 128 : i32
    %39 = tpu.dynamic_rotate %7 by %c128_i32_13 dim 1 : vector<16x256xf32>, i32 -> vector<16x256xf32>
    %40 = arith.mulf %39, %32 : vector<16x256xf32>
    %41 = arith.addf %38, %40 : vector<16x256xf32>
    %c0_14 = arith.constant 0 : index
    %c0_15 = arith.constant 0 : index
    %42 = vector.load %arg7[%c0_14, %c0_15] : memref<16x256xf32, #tpu.memory_space<vmem>>, vector<16x256xf32>
    tpu.vector_store %arg7[%c0_14, %c0_15], %41 {strides = array<i32>} : memref<16x256xf32, #tpu.memory_space<vmem>>, vector<16x256xf32>,
    %c0_16 = arith.constant 0 : index
    %c0_17 = arith.constant 0 : index
    %43 = vector.load %arg8[%c0_16, %c0_17] : memref<16x256xf32, #tpu.memory_space<vmem>>, vector<16x256xf32>
    tpu.vector_store %arg8[%c0_16, %c0_17], %8 {strides = array<i32>} : memref<16x256xf32, #tpu.memory_space<vmem>>, vector<16x256xf32>,
    return
  }
  func.func @transform_0(%arg0: i32, %arg1: i32) -> (i32, i32) {
    %c0_i32 = arith.constant 0 : i32
    %c0_i32_0 = arith.constant 0 : i32
    return %arg0, %c0_i32 : i32, i32
  }
  func.func @transform_1(%arg0: i32, %arg1: i32) -> (i32, i32) {
    %c0_i32 = arith.constant 0 : i32
    %c0_i32_0 = arith.constant 0 : i32
    return %c0_i32, %arg1 : i32, i32
  }
  func.func @transform_2(%arg0: i32, %arg1: i32) -> (i32, i32) {
    %c0_i32 = arith.constant 0 : i32
    %c0_i32_0 = arith.constant 0 : i32
    return %c0_i32, %arg1 : i32, i32
  }
  func.func @transform_3(%arg0: i32, %arg1: i32) -> (i32, i32) {
    %c1_i32 = arith.constant 1 : i32
    %c0_i32 = arith.constant 0 : i32
    %0 = arith.cmpi eq, %c1_i32, %c0_i32 : i32
    %c1_i32_0 = arith.constant 1 : i32
    %1 = arith.select %0, %c1_i32_0, %c1_i32 : i32
    %2 = arith.remsi %arg0, %1 : i32
    %c0_i32_1 = arith.constant 0 : i32
    %3 = arith.cmpi ne, %2, %c0_i32_1 : i32
    %c0_i32_2 = arith.constant 0 : i32
    %4 = arith.cmpi slt, %2, %c0_i32_2 : i32
    %c0_i32_3 = arith.constant 0 : i32
    %5 = arith.cmpi slt, %1, %c0_i32_3 : i32
    %6 = arith.xori %4, %5 : i1
    %7 = arith.andi %6, %3 : i1
    %8 = arith.addi %2, %1 : i32
    %9 = arith.select %7, %8, %2 : i32
    %c0_i32_4 = arith.constant 0 : i32
    %c0_i32_5 = arith.constant 0 : i32
    return %9, %c0_i32_4 : i32, i32
  }
  func.func @transform_4(%arg0: i32, %arg1: i32) -> (i32, i32) {
    %c0_i32 = arith.constant 0 : i32
    return %arg0, %arg1 : i32, i32
  }
  func.func @transform_5(%arg0: i32, %arg1: i32) -> (i32, i32) {
    %c0_i32 = arith.constant 0 : i32
    return %arg0, %arg1 : i32, i32
  }
  func.func @transform_6(%arg0: i32, %arg1: i32) -> (i32, i32) {
    %c0_i32 = arith.constant 0 : i32
    return %arg0, %arg1 : i32, i32
  }
}

</mosaic_0001>

<bundles_post_ra>
// kernel: multi_head_qkv.1
= control target key start
LH: loop header
LB: loop body
LE: loop exit
PB: predicated region body
PF: predicated region fallthrough
CT: control target
= control target key end

     0   :  { %12 = vsyncpa [#allocation3], 0  ;;  %s822_s21 = smov [#allocation2]   ;;  %s982_s0 = inlined_call_operand.vmem [shape: f32[16,256], index: 0, kind: input, shape index: {}]   ;;  %s983_s1 = inlined_call_operand.hbm [shape: f32[256,768], index: 1, kind: input, shape index: {}]   ;;  %s984_s2 = inlined_call_operand.vmem [shape: f32[1,768], index: 2, kind: input, shape index: {}]   ;;  %s985_s3 = inlined_call_operand.vmem [shape: f32[16,512], index: 3, kind: input, shape index: {}]   ;;  %s986_s4 = inlined_call_operand.vmem [shape: f32[16,256], index: 4, kind: output, shape index: {0}]   ;;  %s987_s5 = inlined_call_operand.vmem [shape: f32[16,256], index: 5, kind: output, shape index: {1}]   ;;  %s988_s6 = inlined_call_operand.vmem [shape: f32[16,256], index: 6, kind: output, shape index: {2}]  }
   0x1   :  { %s20_s22 = sshll.u32 %s822_s21, 4  ;;  %s798_s25 = scalar_lea.hbm %s983_s1, 24576  ;;  %s21_s22 = int_to_ptr.vmem [resolvable:$true] %s20_s22 }
   0x2   :  { %p799_p0 = scmp.ne.s32.totalorder %s983_s1, %s798_s25  ;;  %p802_p1 = scmp.lt.u32.totalorder %s798_s25, %s983_s1 }
   0x4   :  { %p804_p2 = pnand %p802_p1, %p799_p0 }
   0x6   :  { %807 = shalt.err (!%p804_p2)
}
   0x7   :  { %s808_s30 = scalar_lea.vmem %s21_s22, 24576  ;;  %p813_p4 = scmp.lt.s32.totalorder %s21_s22, %s21_s22 }
   0x8   :  { %p809_p3 = scmp.ne.s32.totalorder %s21_s22, %s808_s30  ;;  %p814_p5 = scmp.lt.s32.totalorder %s808_s30, %s808_s30 }
   0xa   :  { %p815_p6 = por %p814_p5, %p813_p4 }
   0xc   :  { %p816_p7 = pnand %p815_p6, %p809_p3 }
   0xe   :  { %819 = shalt.err (!%p816_p7)
}
   0xf   :  { %s823_s7 = smov 768   ;;  %s824_s8 = smov 48  }
  0x10   :  { %26 = dma.hbm_to_vmem [thread:$0]  %s983_s1, 24576, %s21_s22, [#allocation3], %s823_s7, %s823_s7, %s824_s8  }
  0x11   :  { %820 = dma.done.wait [#allocation3], 24576  }
  0x12   :  { %821 = vsyncadd [#allocation3], 4294942720  ;;  %v39_v0 = vld [vmem:[#allocation2 + $0x8] sm:$0xff]  ;;  %v45_v1 = vld [vmem:[#allocation2 + $0x38] sm:$0xff] }
  0x13   :  { %v41_v2 = vld [vmem:[#allocation2 + $0x18] sm:$0xff]  ;;  %v571_v3 = vpack.c.bf16 %v45_v1, %v39_v0  ;;  %v47_v4 = vld [vmem:[#allocation2 + $0x48] sm:$0xff]  ;;  %v38_v5 = vld [vmem:[#allocation2] sm:$0xff] }
  0x14   :  { %v44_v6 = vld [vmem:[#allocation2 + $0x30] sm:$0xff]  ;;  %v635_v7 = vpack.c.bf16 %v47_v4, %v41_v2  ;;  %v46_v10 = vld [vmem:[#allocation2 + $0x40] sm:$0xff]  ;;  %v51_v11 = vld [vmem:[#allocation2 + $0x68] sm:$0xff] }
  0x15   :  { %v573_v8 = vpack.c.bf16 %v44_v6, %v38_v5  ;;  %v40_v9 = vld [vmem:[#allocation2 + $0x10] sm:$0xff]  ;;  %572 = vmatprep.subr.bf16.mxu0 %v571_v3  ;;  %v57_v13 = vld [vmem:[#allocation2 + $0x98] sm:$0xff]  ;;  %v59_v15 = vld [vmem:[#allocation2 + $0xa8] sm:$0xff] }
  0x16   :  { %v637_v12 = vpack.c.bf16 %v46_v10, %v40_v9  ;;  %v53_v14 = vld [vmem:[#allocation2 + $0x78] sm:$0xff]  ;;  %636 = vmatprep.subr.bf16.mxu1 %v635_v7  ;;  %v575_v16 = vpack.c.bf16 %v57_v13, %v51_v11  ;;  %v50_v18 = vld [vmem:[#allocation2 + $0x60] sm:$0xff]  ;;  %v56_v19 = vld [vmem:[#allocation2 + $0x90] sm:$0xff] }
  0x17   :  { %574 = vmatpush1.bf16.msra.mxu0 %v573_v8  ;;  %v639_v17 = vpack.c.bf16 %v59_v15, %v53_v14  ;;  %v52_v20 = vld [vmem:[#allocation2 + $0x70] sm:$0xff]  ;;  %v577_v21 = vpack.c.bf16 %v56_v19, %v50_v18  ;;  %v58_v22 = vld [vmem:[#allocation2 + $0xa0] sm:$0xff]  ;;  %v63_v23 = vld [vmem:[#allocation2 + $0xc8] sm:$0xff] }
  0x18   :  { %638 = vmatpush1.bf16.msra.mxu1 %v637_v12  ;;  %v69_v24 = vld [vmem:[#allocation2 + $0xf8] sm:$0xff]  ;;  %576 = vmatprep.subr.bf16.mxu0 %v575_v16  ;;  %v641_v25 = vpack.c.bf16 %v58_v22, %v52_v20  ;;  %v71_v28 = vld [vmem:[#allocation2 + $0x108] sm:$0xff]  ;;  %v62_v29 = vld [vmem:[#allocation2 + $0xc0] sm:$0xff] }
  0x19   :  { %640 = vmatprep.subr.bf16.mxu1 %v639_v17  ;;  %v579_v26 = vpack.c.bf16 %v69_v24, %v63_v23  ;;  %v65_v27 = vld [vmem:[#allocation2 + $0xd8] sm:$0xff]  ;;  %v68_v31 = vld [vmem:[#allocation2 + $0xf0] sm:$0xff]  ;;  %v70_v33 = vld [vmem:[#allocation2 + $0x100] sm:$0xff] }
  0x1a   :  { %v643_v30 = vpack.c.bf16 %v71_v28, %v65_v27  ;;  %v64_v32 = vld [vmem:[#allocation2 + $0xd0] sm:$0xff]  ;;  %v581_v34 = vpack.c.bf16 %v68_v31, %v62_v29  ;;  %v75_v35 = vld [vmem:[#allocation2 + $0x128] sm:$0xff]  ;;  %v81_v36 = vld [vmem:[#allocation2 + $0x158] sm:$0xff] }
  0x1b   :  { %578 = vmatpush1.bf16.msra.mxu0 %v577_v21  ;;  %v77_v37 = vld [vmem:[#allocation2 + $0x138] sm:$0xff]  ;;  %v645_v38 = vpack.c.bf16 %v70_v33, %v64_v32  ;;  %v583_v39 = vpack.c.bf16 %v81_v36, %v75_v35  ;;  %v83_v40 = vld [vmem:[#allocation2 + $0x168] sm:$0xff]  ;;  %v74_v41 = vld [vmem:[#allocation2 + $0x120] sm:$0xff] }
  0x1c   :  { %642 = vmatpush1.bf16.msra.mxu1 %v641_v25  ;;  %580 = vmatprep.subr.bf16.mxu0 %v579_v26  ;;  %v80_v42 = vld [vmem:[#allocation2 + $0x150] sm:$0xff]  ;;  %v647_v43 = vpack.c.bf16 %v83_v40, %v77_v37  ;;  %v82_v45 = vld [vmem:[#allocation2 + $0x160] sm:$0xff]  ;;  %v87_v46 = vld [vmem:[#allocation2 + $0x188] sm:$0xff] }
  0x1d   :  { %644 = vmatprep.subr.bf16.mxu1 %v643_v30  ;;  %v76_v44 = vld [vmem:[#allocation2 + $0x130] sm:$0xff]  ;;  %v93_v47 = vld [vmem:[#allocation2 + $0x1b8] sm:$0xff]  ;;  %v95_v49 = vld [vmem:[#allocation2 + $0x1c8] sm:$0xff]  ;;  %v585_v50 = vpack.c.bf16 %v80_v42, %v74_v41 }
  0x1e   :  { %v89_v48 = vld [vmem:[#allocation2 + $0x198] sm:$0xff]  ;;  %v649_v51 = vpack.c.bf16 %v82_v45, %v76_v44  ;;  %v587_v52 = vpack.c.bf16 %v93_v47, %v87_v46  ;;  %v86_v53 = vld [vmem:[#allocation2 + $0x180] sm:$0xff]  ;;  %v92_v54 = vld [vmem:[#allocation2 + $0x1b0] sm:$0xff] }
  0x1f   :  { %582 = vmatpush1.bf16.msra.mxu0 %v581_v34  ;;  %v88_v55 = vld [vmem:[#allocation2 + $0x190] sm:$0xff]  ;;  %v651_v56 = vpack.c.bf16 %v95_v49, %v89_v48  ;;  %v94_v57 = vld [vmem:[#allocation2 + $0x1c0] sm:$0xff]  ;;  %v99_v58 = vld [vmem:[#allocation2 + $0x1e8] sm:$0xff]  ;;  %v589_v62 = vpack.c.bf16 %v92_v54, %v86_v53 }
  0x20   :  { %646 = vmatpush1.bf16.msra.mxu1 %v645_v38  ;;  %584 = vmatprep.subr.bf16.mxu0 %v583_v39  ;;  %v105_v59 = vld [vmem:[#allocation2 + $0x218] sm:$0xff]  ;;  %v107_v61 = vld [vmem:[#allocation2 + $0x228] sm:$0xff]  ;;  %v653_v63 = vpack.c.bf16 %v94_v57, %v88_v55  ;;  %v98_v1 = vld [vmem:[#allocation2 + $0x1e0] sm:$0xff] }
  0x21   :  { %648 = vmatprep.subr.bf16.mxu1 %v647_v43  ;;  %v101_v60 = vld [vmem:[#allocation2 + $0x1f8] sm:$0xff]  ;;  %v591_v0 = vpack.c.bf16 %v105_v59, %v99_v58  ;;  %v104_v2 = vld [vmem:[#allocation2 + $0x210] sm:$0xff]  ;;  %v106_v5 = vld [vmem:[#allocation2 + $0x220] sm:$0xff] }
  0x22   :  { %v100_v3 = vld [vmem:[#allocation2 + $0x1f0] sm:$0xff]  ;;  %v655_v4 = vpack.c.bf16 %v107_v61, %v101_v60  ;;  %v111_v6 = vld [vmem:[#allocation2 + $0x248] sm:$0xff]  ;;  %v117_v7 = vld [vmem:[#allocation2 + $0x278] sm:$0xff]  ;;  %v593_v10 = vpack.c.bf16 %v104_v2, %v98_v1 }
  0x23   :  { %586 = vmatpush1.bf16.msra.mxu0 %v585_v50  ;;  %v113_v8 = vld [vmem:[#allocation2 + $0x258] sm:$0xff]  ;;  %v119_v9 = vld [vmem:[#allocation2 + $0x288] sm:$0xff]  ;;  %v657_v11 = vpack.c.bf16 %v106_v5, %v100_v3  ;;  %v595_v12 = vpack.c.bf16 %v117_v7, %v111_v6  ;;  %v110_v13 = vld [vmem:[#allocation2 + $0x240] sm:$0xff] }
  0x24   :  { %650 = vmatpush1.bf16.msra.mxu1 %v649_v51  ;;  %588 = vmatprep.subr.bf16.mxu0 %v587_v52  ;;  %v116_v14 = vld [vmem:[#allocation2 + $0x270] sm:$0xff]  ;;  %v659_v16 = vpack.c.bf16 %v119_v9, %v113_v8  ;;  %v118_v17 = vld [vmem:[#allocation2 + $0x280] sm:$0xff]  ;;  %v123_v18 = vld [vmem:[#allocation2 + $0x2a8] sm:$0xff] }
  0x25   :  { %652 = vmatprep.subr.bf16.mxu1 %v651_v56  ;;  %v112_v15 = vld [vmem:[#allocation2 + $0x250] sm:$0xff]  ;;  %v129_v19 = vld [vmem:[#allocation2 + $0x2d8] sm:$0xff]  ;;  %v131_v21 = vld [vmem:[#allocation2 + $0x2e8] sm:$0xff]  ;;  %v597_v22 = vpack.c.bf16 %v116_v14, %v110_v13 }
  0x26   :  { %v125_v20 = vld [vmem:[#allocation2 + $0x2b8] sm:$0xff]  ;;  %v661_v23 = vpack.c.bf16 %v118_v17, %v112_v15  ;;  %v599_v24 = vpack.c.bf16 %v129_v19, %v123_v18  ;;  %v122_v25 = vld [vmem:[#allocation2 + $0x2a0] sm:$0xff]  ;;  %v128_v26 = vld [vmem:[#allocation2 + $0x2d0] sm:$0xff] }
  0x27   :  { %590 = vmatpush1.bf16.msra.mxu0 %v589_v62  ;;  %v124_v27 = vld [vmem:[#allocation2 + $0x2b0] sm:$0xff]  ;;  %v663_v28 = vpack.c.bf16 %v131_v21, %v125_v20  ;;  %v130_v29 = vld [vmem:[#allocation2 + $0x2e0] sm:$0xff]  ;;  %v135_v30 = vld [vmem:[#allocation2 + $0x308] sm:$0xff]  ;;  %v601_v34 = vpack.c.bf16 %v128_v26, %v122_v25 }
  0x28   :  { %654 = vmatpush1.bf16.msra.mxu1 %v653_v63  ;;  %592 = vmatprep.subr.bf16.mxu0 %v591_v0  ;;  %v141_v31 = vld [vmem:[#allocation2 + $0x338] sm:$0xff]  ;;  %v143_v33 = vld [vmem:[#allocation2 + $0x348] sm:$0xff]  ;;  %v665_v35 = vpack.c.bf16 %v130_v29, %v124_v27  ;;  %v134_v37 = vld [vmem:[#allocation2 + $0x300] sm:$0xff] }
  0x29   :  { %656 = vmatprep.subr.bf16.mxu1 %v655_v4  ;;  %v137_v32 = vld [vmem:[#allocation2 + $0x318] sm:$0xff]  ;;  %v603_v36 = vpack.c.bf16 %v141_v31, %v135_v30  ;;  %v140_v38 = vld [vmem:[#allocation2 + $0x330] sm:$0xff]  ;;  %v142_v41 = vld [vmem:[#allocation2 + $0x340] sm:$0xff] }
  0x2a   :  { %v136_v39 = vld [vmem:[#allocation2 + $0x310] sm:$0xff]  ;;  %v667_v40 = vpack.c.bf16 %v143_v33, %v137_v32  ;;  %v147_v42 = vld [vmem:[#allocation2 + $0x368] sm:$0xff]  ;;  %v153_v43 = vld [vmem:[#allocation2 + $0x398] sm:$0xff]  ;;  %v605_v46 = vpack.c.bf16 %v140_v38, %v134_v37 }
  0x2b   :  { %594 = vmatpush1.bf16.msra.mxu0 %v593_v10  ;;  %v149_v44 = vld [vmem:[#allocation2 + $0x378] sm:$0xff]  ;;  %v155_v45 = vld [vmem:[#allocation2 + $0x3a8] sm:$0xff]  ;;  %v669_v47 = vpack.c.bf16 %v142_v41, %v136_v39  ;;  %v607_v48 = vpack.c.bf16 %v153_v43, %v147_v42  ;;  %v146_v49 = vld [vmem:[#allocation2 + $0x360] sm:$0xff] }
  0x2c   :  { %658 = vmatpush1.bf16.msra.mxu1 %v657_v11  ;;  %596 = vmatprep.subr.bf16.mxu0 %v595_v12  ;;  %v152_v50 = vld [vmem:[#allocation2 + $0x390] sm:$0xff]  ;;  %v671_v52 = vpack.c.bf16 %v155_v45, %v149_v44  ;;  %v154_v53 = vld [vmem:[#allocation2 + $0x3a0] sm:$0xff]  ;;  %v159_v54 = vld [vmem:[#allocation2 + $0x3c8] sm:$0xff] }
  0x2d   :  { %660 = vmatprep.subr.bf16.mxu1 %v659_v16  ;;  %v148_v51 = vld [vmem:[#allocation2 + $0x370] sm:$0xff]  ;;  %v165_v55 = vld [vmem:[#allocation2 + $0x3f8] sm:$0xff]  ;;  %v167_v57 = vld [vmem:[#allocation2 + $0x408] sm:$0xff]  ;;  %v609_v58 = vpack.c.bf16 %v152_v50, %v146_v49 }
  0x2e   :  { %v161_v56 = vld [vmem:[#allocation2 + $0x3d8] sm:$0xff]  ;;  %v673_v59 = vpack.c.bf16 %v154_v53, %v148_v51  ;;  %v611_v60 = vpack.c.bf16 %v165_v55, %v159_v54  ;;  %v158_v61 = vld [vmem:[#allocation2 + $0x3c0] sm:$0xff]  ;;  %v164_v62 = vld [vmem:[#allocation2 + $0x3f0] sm:$0xff] }
  0x2f   :  { %598 = vmatpush1.bf16.msra.mxu0 %v597_v22  ;;  %v160_v63 = vld [vmem:[#allocation2 + $0x3d0] sm:$0xff]  ;;  %v675_v0 = vpack.c.bf16 %v167_v57, %v161_v56  ;;  %v166_v1 = vld [vmem:[#allocation2 + $0x400] sm:$0xff]  ;;  %v171_v2 = vld [vmem:[#allocation2 + $0x428] sm:$0xff]  ;;  %v613_v6 = vpack.c.bf16 %v164_v62, %v158_v61 }
  0x30   :  { %662 = vmatpush1.bf16.msra.mxu1 %v661_v23  ;;  %600 = vmatprep.subr.bf16.mxu0 %v599_v24  ;;  %v177_v3 = vld [vmem:[#allocation2 + $0x458] sm:$0xff]  ;;  %v179_v5 = vld [vmem:[#allocation2 + $0x468] sm:$0xff]  ;;  %v170_v7 = vld [vmem:[#allocation2 + $0x420] sm:$0xff]  ;;  %v677_v8 = vpack.c.bf16 %v166_v1, %v160_v63 }
  0x31   :  { %664 = vmatprep.subr.bf16.mxu1 %v663_v28  ;;  %v173_v4 = vld [vmem:[#allocation2 + $0x438] sm:$0xff]  ;;  %v615_v9 = vpack.c.bf16 %v177_v3, %v171_v2  ;;  %v176_v10 = vld [vmem:[#allocation2 + $0x450] sm:$0xff]  ;;  %v178_v12 = vld [vmem:[#allocation2 + $0x460] sm:$0xff] }
  0x32   :  { %v172_v11 = vld [vmem:[#allocation2 + $0x430] sm:$0xff]  ;;  %v679_v13 = vpack.c.bf16 %v179_v5, %v173_v4  ;;  %v183_v14 = vld [vmem:[#allocation2 + $0x488] sm:$0xff]  ;;  %v189_v15 = vld [vmem:[#allocation2 + $0x4b8] sm:$0xff]  ;;  %v617_v19 = vpack.c.bf16 %v176_v10, %v170_v7 }
  0x33   :  { %602 = vmatpush1.bf16.msra.mxu0 %v601_v34  ;;  %v875_v16 = vld [vmem:[%s982_s0 + $0x8] sm:$0xff]  ;;  %v185_v17 = vld [vmem:[#allocation2 + $0x498] sm:$0xff]  ;;  %v681_v20 = vpack.c.bf16 %v178_v12, %v172_v11  ;;  %v619_v21 = vpack.c.bf16 %v189_v15, %v183_v14  ;;  %v182_v22 = vld [vmem:[#allocation2 + $0x480] sm:$0xff] }
  0x34   :  { %666 = vmatpush1.bf16.msra.mxu1 %v665_v35  ;;  %604 = vmatprep.subr.bf16.mxu0 %v603_v36  ;;  %v191_v18 = vld [vmem:[#allocation2 + $0x4c8] sm:$0xff]  ;;  %v188_v23 = vld [vmem:[#allocation2 + $0x4b0] sm:$0xff]  ;;  %v190_v26 = vld [vmem:[#allocation2 + $0x4c0] sm:$0xff] }
  0x35   :  { %668 = vmatprep.subr.bf16.mxu1 %v667_v40  ;;  %326 = vmatprep.mubr.f32.mxu0 %v875_v16  ;;  %v184_v24 = vld [vmem:[#allocation2 + $0x490] sm:$0xff]  ;;  %v683_v25 = vpack.c.bf16 %v191_v18, %v185_v17  ;;  %v195_v27 = vld [vmem:[#allocation2 + $0x4e8] sm:$0xff]  ;;  %v201_v28 = vld [vmem:[#allocation2 + $0x518] sm:$0xff]  ;;  %v621_v31 = vpack.c.bf16 %v188_v23, %v182_v22 }
  0x36   :  { %403 = vmatprep.mubr.f32.mxu1 %v875_v16  ;;  %v197_v29 = vld [vmem:[#allocation2 + $0x4f8] sm:$0xff]  ;;  %v203_v30 = vld [vmem:[#allocation2 + $0x528] sm:$0xff]  ;;  %v685_v32 = vpack.c.bf16 %v190_v26, %v184_v24  ;;  %v623_v33 = vpack.c.bf16 %v201_v28, %v195_v27  ;;  %v194_v34 = vld [vmem:[#allocation2 + $0x4e0] sm:$0xff] }
  0x37   :  { %606 = vmatpush1.bf16.msra.mxu0 %v605_v46  ;;  %v200_v35 = vld [vmem:[#allocation2 + $0x510] sm:$0xff]  ;;  %v687_v37 = vpack.c.bf16 %v203_v30, %v197_v29  ;;  %v202_v38 = vld [vmem:[#allocation2 + $0x520] sm:$0xff]  ;;  %v207_v39 = vld [vmem:[#allocation2 + $0x548] sm:$0xff] }
  0x38   :  { %670 = vmatpush1.bf16.msra.mxu1 %v669_v47  ;;  %608 = vmatprep.subr.bf16.mxu0 %v607_v48  ;;  %v196_v36 = vld [vmem:[#allocation2 + $0x4f0] sm:$0xff]  ;;  %v213_v40 = vld [vmem:[#allocation2 + $0x578] sm:$0xff]  ;;  %v215_v42 = vld [vmem:[#allocation2 + $0x588] sm:$0xff]  ;;  %v625_v43 = vpack.c.bf16 %v200_v35, %v194_v34 }
  0x39   :  { %672 = vmatprep.subr.bf16.mxu1 %v671_v52  ;;  %v209_v41 = vld [vmem:[#allocation2 + $0x558] sm:$0xff]  ;;  %v689_v44 = vpack.c.bf16 %v202_v38, %v196_v36  ;;  %v627_v45 = vpack.c.bf16 %v213_v40, %v207_v39  ;;  %v206_v46 = vld [vmem:[#allocation2 + $0x540] sm:$0xff]  ;;  %v212_v47 = vld [vmem:[#allocation2 + $0x570] sm:$0xff] }
  0x3a   :  { %v208_v48 = vld [vmem:[#allocation2 + $0x550] sm:$0xff]  ;;  %v691_v49 = vpack.c.bf16 %v215_v42, %v209_v41  ;;  %v214_v50 = vld [vmem:[#allocation2 + $0x580] sm:$0xff]  ;;  %v219_v51 = vld [vmem:[#allocation2 + $0x5a8] sm:$0xff]  ;;  %v629_v55 = vpack.c.bf16 %v212_v47, %v206_v46 }
  0x3b   :  { %610 = vmatpush1.bf16.msra.mxu0 %v609_v58  ;;  %v225_v52 = vld [vmem:[#allocation2 + $0x5d8] sm:$0xff]  ;;  %v227_v54 = vld [vmem:[#allocation2 + $0x5e8] sm:$0xff]  ;;  %v693_v56 = vpack.c.bf16 %v214_v50, %v208_v48  ;;  %v218_v58 = vld [vmem:[#allocation2 + $0x5a0] sm:$0xff] }
  0x3c   :  { %674 = vmatpush1.bf16.msra.mxu1 %v673_v59  ;;  %612 = vmatprep.subr.bf16.mxu0 %v611_v60  ;;  %v221_v53 = vld [vmem:[#allocation2 + $0x5b8] sm:$0xff]  ;;  %v631_v57 = vpack.c.bf16 %v225_v52, %v219_v51  ;;  %v224_v59 = vld [vmem:[#allocation2 + $0x5d0] sm:$0xff]  ;;  %v226_v62 = vld [vmem:[#allocation2 + $0x5e0] sm:$0xff] }
  0x3d   :  { %676 = vmatprep.subr.bf16.mxu1 %v675_v0  ;;  %v220_v60 = vld [vmem:[#allocation2 + $0x5b0] sm:$0xff]  ;;  %v695_v61 = vpack.c.bf16 %v227_v54, %v221_v53  ;;  %v43_v63 = vld [vmem:[#allocation2 + $0x28] sm:$0xff]  ;;  %v49_v0 = vld [vmem:[#allocation2 + $0x58] sm:$0xff]  ;;  %v633_v1 = vpack.c.bf16 %v224_v59, %v218_v58 }
  0x3e   :  { %v697_v2 = vpack.c.bf16 %v226_v62, %v220_v60  ;;  %v699_v3 = vpack.c.bf16 %v49_v0, %v43_v63  ;;  %v42_v4 = vld [vmem:[#allocation2 + $0x20] sm:$0xff]  ;;  %v48_v5 = vld [vmem:[#allocation2 + $0x50] sm:$0xff]  ;;  %v61_v7 = vld [vmem:[#allocation2 + $0xb8] sm:$0xff] }
  0x3f   :  { %614 = vmatpush1.bf16.msra.mxu0 %v613_v6  ;;  %v55_v6 = vld [vmem:[#allocation2 + $0x88] sm:$0xff]  ;;  %v54_v11 = vld [vmem:[#allocation2 + $0x80] sm:$0xff]  ;;  %v60_v12 = vld [vmem:[#allocation2 + $0xb0] sm:$0xff] }
  0x40   :  { %678 = vmatpush1.bf16.msra.mxu1 %v677_v8  ;;  %616 = vmatprep.subr.bf16.mxu0 %v615_v9  ;;  %v882_v8 = vld [vmem:[%s982_s0] sm:$0xff]  ;;  %v701_v9 = vpack.c.bf16 %v48_v5, %v42_v4  ;;  %v703_v10 = vpack.c.bf16 %v61_v7, %v55_v6  ;;  %v73_v14 = vld [vmem:[#allocation2 + $0x118] sm:$0xff]  ;;  %v705_v17 = vpack.c.bf16 %v60_v12, %v54_v11  ;;  %v892_v18 = vld [vmem:[%s982_s0 + $0x10] sm:$0xff] }
  0x41   :  { %680 = vmatprep.subr.bf16.mxu1 %v679_v13  ;;  %v67_v13 = vld [vmem:[#allocation2 + $0xe8] sm:$0xff]  ;;  %v37_v15 = vld [vmem:[%s982_s0 + $0x18] sm:$0xff]  ;;  %v78_v26 = vld [vmem:[#allocation2 + $0x140] sm:$0xff] }
  0x42   :  { %v79_v22 = vld [vmem:[#allocation2 + $0x148] sm:$0xff]  ;;  %v85_v23 = vld [vmem:[#allocation2 + $0x178] sm:$0xff]  ;;  %v84_v27 = vld [vmem:[#allocation2 + $0x170] sm:$0xff] }
  0x43   :  { %618 = vmatpush1.bf16.msra.mxu0 %v617_v19  ;;  %v707_v19 = vpack.c.bf16 %v73_v14, %v67_v13  ;;  %v91_v28 = vld [vmem:[#allocation2 + $0x1a8] sm:$0xff]  ;;  %v97_v29 = vld [vmem:[#allocation2 + $0x1d8] sm:$0xff]  ;;  %v713_v30 = vpack.c.bf16 %v84_v27, %v78_v26  ;;  %v102_v38 = vld [vmem:[#allocation2 + $0x200] sm:$0xff] }
  0x44   :  { %682 = vmatpush1.bf16.msra.mxu1 %v681_v20  ;;  %620 = vmatprep.subr.bf16.mxu0 %v619_v21  ;;  %v66_v20 = vld [vmem:[#allocation2 + $0xe0] sm:$0xff]  ;;  %v72_v21 = vld [vmem:[#allocation2 + $0x110] sm:$0xff]  ;;  %v103_v34 = vld [vmem:[#allocation2 + $0x208] sm:$0xff] }
  0x45   :  { %684 = vmatprep.subr.bf16.mxu1 %v683_v25  ;;  %v709_v24 = vpack.c.bf16 %v72_v21, %v66_v20  ;;  %v711_v25 = vpack.c.bf16 %v85_v23, %v79_v22  ;;  %v109_v35 = vld [vmem:[#allocation2 + $0x238] sm:$0xff]  ;;  %v108_v39 = vld [vmem:[#allocation2 + $0x230] sm:$0xff]  ;;  %v139_v51 = vld [vmem:[#allocation2 + $0x328] sm:$0xff] }
  0x46   :  { %v121_v40 = vld [vmem:[#allocation2 + $0x298] sm:$0xff]  ;;  %v721_v41 = vpack.c.bf16 %v108_v39, %v102_v38  ;;  %v132_v50 = vld [vmem:[#allocation2 + $0x2f0] sm:$0xff]  ;;  %v163_v63 = vld [vmem:[#allocation2 + $0x3e8] sm:$0xff]  ;;  %v232_v39 = vlaneseq }
  0x47   :  { %622 = vmatpush1.bf16.msra.mxu0 %v621_v31  ;;  %v715_v31 = vpack.c.bf16 %v97_v29, %v91_v28  ;;  %v133_v46 = vld [vmem:[#allocation2 + $0x2f8] sm:$0xff]  ;;  %v156_v62 = vld [vmem:[#allocation2 + $0x3b0] sm:$0xff]  ;;  %v175_v5 = vld [vmem:[#allocation2 + $0x448] sm:$0xff] }
  0x48   :  { %686 = vmatpush1.bf16.msra.mxu1 %v685_v32  ;;  %624 = vmatprep.subr.bf16.mxu0 %v623_v33  ;;  %v90_v32 = vld [vmem:[#allocation2 + $0x1a0] sm:$0xff]  ;;  %v96_v33 = vld [vmem:[#allocation2 + $0x1d0] sm:$0xff]  ;;  %v145_v52 = vld [vmem:[#allocation2 + $0x358] sm:$0xff] }
  0x49   :  { %688 = vmatprep.subr.bf16.mxu1 %v687_v37  ;;  %v717_v36 = vpack.c.bf16 %v96_v33, %v90_v32  ;;  %v719_v37 = vpack.c.bf16 %v109_v35, %v103_v34  ;;  %v731_v54 = vpack.c.bf16 %v145_v52, %v139_v51  ;;  %v157_v58 = vld [vmem:[#allocation2 + $0x3b8] sm:$0xff]  ;;  %v168_v4 = vld [vmem:[#allocation2 + $0x410] sm:$0xff]  ;;  %v187_v12 = vld [vmem:[#allocation2 + $0x4a8] sm:$0xff] }
  0x4a   :  { %v169_v0 = vld [vmem:[#allocation2 + $0x418] sm:$0xff]  ;;  %v180_v11 = vld [vmem:[#allocation2 + $0x470] sm:$0xff]  ;;  %v199_v20 = vld [vmem:[#allocation2 + $0x508] sm:$0xff] }
  0x4b   :  { %626 = vmatpush1.bf16.msra.mxu0 %v625_v43  ;;  %v114_v43 = vld [vmem:[#allocation2 + $0x260] sm:$0xff]  ;;  %v181_v6 = vld [vmem:[#allocation2 + $0x478] sm:$0xff]  ;;  %v211_v26 = vld [vmem:[#allocation2 + $0x568] sm:$0xff] }
  0x4c   :  { %690 = vmatpush1.bf16.msra.mxu1 %v689_v44  ;;  %628 = vmatprep.subr.bf16.mxu0 %v627_v45  ;;  %v120_v44 = vld [vmem:[#allocation2 + $0x290] sm:$0xff]  ;;  %v127_v45 = vld [vmem:[#allocation2 + $0x2c8] sm:$0xff]  ;;  %v193_v13 = vld [vmem:[#allocation2 + $0x4d8] sm:$0xff] }
  0x4d   :  { %692 = vmatprep.subr.bf16.mxu1 %v691_v49  ;;  %v725_v47 = vpack.c.bf16 %v120_v44, %v114_v43  ;;  %v727_v48 = vpack.c.bf16 %v133_v46, %v127_v45  ;;  %v126_v49 = vld [vmem:[#allocation2 + $0x2c0] sm:$0xff]  ;;  %v205_v21 = vld [vmem:[#allocation2 + $0x538] sm:$0xff]  ;;  %v223_v32 = vld [vmem:[#allocation2 + $0x5c8] sm:$0xff] }
  0x4e   :  { %v729_v53 = vpack.c.bf16 %v132_v50, %v126_v49  ;;  %v751_v23 = vpack.c.bf16 %v205_v21, %v199_v20  ;;  %v217_v27 = vld [vmem:[#allocation2 + $0x598] sm:$0xff]  ;;  %v494_v46 = vld [vmem:[%s985_s3 + $0x8] sm:$0xff]  ;;  %v493_v52 = vld [vmem:[%s985_s3] sm:$0xff] }
  0x4f   :  { %630 = vmatpush1.bf16.msra.mxu0 %v629_v55  ;;  %v138_v55 = vld [vmem:[#allocation2 + $0x320] sm:$0xff]  ;;  %v755_v29 = vpack.c.bf16 %v217_v27, %v211_v26  ;;  %v229_v33 = vld [vmem:[#allocation2 + $0x5f8] sm:$0xff] }
  0x50   :  { %694 = vmatpush1.bf16.msra.mxu1 %v693_v56  ;;  %632 = vmatprep.subr.bf16.mxu0 %v631_v57  ;;  %v144_v56 = vld [vmem:[#allocation2 + $0x350] sm:$0xff]  ;;  %v151_v57 = vld [vmem:[#allocation2 + $0x388] sm:$0xff]  ;;  %v759_v35 = vpack.c.bf16 %v229_v33, %v223_v32 }
  0x51   :  { %696 = vmatprep.subr.bf16.mxu1 %v695_v61  ;;  %v733_v59 = vpack.c.bf16 %v144_v56, %v138_v55  ;;  %v735_v60 = vpack.c.bf16 %v157_v58, %v151_v57  ;;  %v150_v61 = vld [vmem:[#allocation2 + $0x380] sm:$0xff]  ;;  %v495_v57 = vld [vmem:[%s985_s3 + $0x10] sm:$0xff] }
  0x53   :  { %634 = vmatpush1.bf16.msra.mxu0 %v633_v1  ;;  %v737_v1 = vpack.c.bf16 %v156_v62, %v150_v61 }
  0x54   :  { %698 = vmatpush1.bf16.msra.mxu1 %v697_v2  ;;  %700 = vmatprep.subr.bf16.mxu0 %v699_v3  ;;  %v739_v2 = vpack.c.bf16 %v169_v0, %v163_v63  ;;  %v500_v63 = vld [vmem:[%s985_s3 + $0x38] sm:$0xff] }
  0x55   :  { %763 = vmatprep.subr.bf16.mxu1 %v699_v3  ;;  %v162_v3 = vld [vmem:[#allocation2 + $0x3e0] sm:$0xff] }
  0x56   :  { %327 = vmatmul.mubr.f32.vlgmr.msra.gmra.mrb[0].mxu0 %v882_v8  ;;  %v741_v7 = vpack.c.bf16 %v168_v4, %v162_v3 }
  0x57   :  { %404 = vmatmul.mubr.f32.vlgmr.msra.gmra.mrb[0].mxu1 %v882_v8  ;;  %702 = vmatpush1.bf16.msra.mxu0 %v701_v9 }
  0x58   :  { %779 = vmatpush1.bf16.msra.mxu1 %v701_v9  ;;  %704 = vmatprep.subr.bf16.mxu0 %v703_v10  ;;  %v743_v9 = vpack.c.bf16 %v181_v6, %v175_v5 }
  0x59   :  { %764 = vmatprep.subr.bf16.mxu1 %v703_v10  ;;  %332 = vmatprep.mubr.f32.mxu0 %v37_v15  ;;  %v174_v10 = vld [vmem:[#allocation2 + $0x440] sm:$0xff] }
  0x5a   :  { %409 = vmatprep.mubr.f32.mxu1 %v37_v15  ;;  %333 = vmatmul.mubr.f32.gmra.mrb[2].mxu0 %v892_v18  ;;  %v745_v14 = vpack.c.bf16 %v180_v11, %v174_v10  ;;  %v497_v10 = vld [vmem:[%s985_s3 + $0x20] sm:$0xff] }
  0x5b   :  { %706 = vmatpush1.bf16.msra.mxu0 %v705_v17  ;;  %410 = vmatmul.mubr.f32.gmra.mrb[2].mxu1 %v892_v18 }
  0x5c   :  { %780 = vmatpush1.bf16.msra.mxu1 %v705_v17  ;;  %708 = vmatprep.subr.bf16.mxu0 %v707_v19  ;;  %v186_v17 = vld [vmem:[#allocation2 + $0x4a0] sm:$0xff] }
  0x5d   :  { %765 = vmatprep.subr.bf16.mxu1 %v707_v19  ;;  %480 = vmatprep.mubr.f32.mxu0 %v875_v16  ;;  %v115_v16 = vld [vmem:[#allocation2 + $0x268] sm:$0xff]  ;;  %v192_v19 = vld [vmem:[#allocation2 + $0x4d0] sm:$0xff] }
  0x5e   :  { %486 = vmatprep.mubr.f32.mxu1 %v37_v15  ;;  %v723_v42 = vpack.c.bf16 %v121_v40, %v115_v16  ;;  %v747_v15 = vpack.c.bf16 %v193_v13, %v187_v12  ;;  %v749_v22 = vpack.c.bf16 %v192_v19, %v186_v17  ;;  %v899_v16 = vshrl.u32 %v232_v39, 7 }
  0x5f   :  { %710 = vmatpush1.bf16.msra.mxu0 %v709_v24  ;;  %v517_v17 = vsub.f32 0.0, %v500_v63 }
  0x60   :  { %781 = vmatpush1.bf16.msra.mxu1 %v709_v24  ;;  %712 = vmatprep.subr.bf16.mxu0 %v711_v25  ;;  %v198_v24 = vld [vmem:[#allocation2 + $0x500] sm:$0xff]  ;;  %v254_v40 = vsub.s32 5, %v899_v16  ;;  %v234_v43 = vsub.s32 0, %v899_v16  ;;  %v242_v44 = vsub.s32 2, %v899_v16 }
  0x61   :  { %766 = vmatprep.subr.bf16.mxu1 %v711_v25  ;;  %v204_v25 = vld [vmem:[#allocation2 + $0x530] sm:$0xff] }
  0x62   :  { %v753_v28 = vpack.c.bf16 %v204_v25, %v198_v24 }
  0x63   :  { %714 = vmatpush1.bf16.msra.mxu0 %v713_v30 }
  0x64   :  { %782 = vmatpush1.bf16.msra.mxu1 %v713_v30  ;;  %716 = vmatprep.subr.bf16.mxu0 %v715_v31  ;;  %v210_v30 = vld [vmem:[#allocation2 + $0x560] sm:$0xff] }
  0x65   :  { %767 = vmatprep.subr.bf16.mxu1 %v715_v31  ;;  %v216_v31 = vld [vmem:[#allocation2 + $0x590] sm:$0xff] }
  0x66   :  { %v757_v34 = vpack.c.bf16 %v216_v31, %v210_v30 }
  0x67   :  { %718 = vmatpush1.bf16.msra.mxu0 %v717_v36 }
  0x68   :  { %783 = vmatpush1.bf16.msra.mxu1 %v717_v36  ;;  %720 = vmatprep.subr.bf16.mxu0 %v719_v37  ;;  %v222_v36 = vld [vmem:[#allocation2 + $0x5c0] sm:$0xff] }
  0x69   :  { %768 = vmatprep.subr.bf16.mxu1 %v719_v37  ;;  %v228_v37 = vld [vmem:[#allocation2 + $0x5f0] sm:$0xff] }
  0x6a   :  { %v761_v38 = vpack.c.bf16 %v228_v37, %v222_v36 }
  0x6b   :  { %722 = vmatpush1.bf16.msra.mxu0 %v721_v41 }
  0x6c   :  { %784 = vmatpush1.bf16.msra.mxu1 %v721_v41  ;;  %724 = vmatprep.subr.bf16.mxu0 %v723_v42  ;;  %v905_v41 = vld [vmem:[%s984_s2] sm:$0x3f] }
  0x6d   :  { %769 = vmatprep.subr.bf16.mxu1 %v723_v42  ;;  %v908_v42 = vrot.slane %v905_v41, %v254_v40  ;;  %v235_v45 = vrot.slane %v905_v41, %v234_v43  ;;  %v250_v40 = vsub.s32 4, %v899_v16 }
  0x6f   :  { %726 = vmatpush1.bf16.msra.mxu0 %v725_v47  ;;  %v251_v43 = vrot.slane %v905_v41, %v250_v40 }
  0x70   :  { %785 = vmatpush1.bf16.msra.mxu1 %v725_v47  ;;  %728 = vmatprep.subr.bf16.mxu0 %v727_v48  ;;  %v243_v47 = vrot.slane %v905_v41, %v242_v44 }
  0x71   :  { %770 = vmatprep.subr.bf16.mxu1 %v727_v48  ;;  %v496_v48 = vld [vmem:[%s985_s3 + $0x18] sm:$0xff] }
  0x73   :  { %730 = vmatpush1.bf16.msra.mxu0 %v729_v53 }
  0x74   :  { %786 = vmatpush1.bf16.msra.mxu1 %v729_v53  ;;  %732 = vmatprep.subr.bf16.mxu0 %v731_v54  ;;  %v506_v53 = vsub.f32 0.0, %v494_v46 }
  0x75   :  { %771 = vmatprep.subr.bf16.mxu1 %v731_v54  ;;  %v498_v54 = vld [vmem:[%s985_s3 + $0x28] sm:$0xff] }
  0x76   :  { %v507_v3 = vsub.f32 0.0, %v498_v54 }
  0x77   :  { %734 = vmatpush1.bf16.msra.mxu0 %v733_v59 }
  0x78   :  { %787 = vmatpush1.bf16.msra.mxu1 %v733_v59  ;;  %736 = vmatprep.subr.bf16.mxu0 %v735_v60  ;;  %v516_v59 = vsub.f32 0.0, %v496_v48 }
  0x79   :  { %772 = vmatprep.subr.bf16.mxu1 %v735_v60 }
  0x7b   :  { %738 = vmatpush1.bf16.msra.mxu0 %v737_v1 }
  0x7c   :  { %788 = vmatpush1.bf16.msra.mxu1 %v737_v1  ;;  %740 = vmatprep.subr.bf16.mxu0 %v739_v2 }
  0x7d   :  { %773 = vmatprep.subr.bf16.mxu1 %v739_v2 }
  0x7f   :  { %742 = vmatpush1.bf16.msra.mxu0 %v741_v7 }
  0x80   :  { %789 = vmatpush1.bf16.msra.mxu1 %v741_v7  ;;  %744 = vmatprep.subr.bf16.mxu0 %v743_v9 }
  0x81   :  { %774 = vmatprep.subr.bf16.mxu1 %v743_v9 }
  0x83   :  { %746 = vmatpush1.bf16.msra.mxu0 %v745_v14 }
  0x84   :  { %790 = vmatpush1.bf16.msra.mxu1 %v745_v14  ;;  %748 = vmatprep.subr.bf16.mxu0 %v747_v15 }
  0x85   :  { %775 = vmatprep.subr.bf16.mxu1 %v747_v15 }
  0x87   :  { %750 = vmatpush1.bf16.msra.mxu0 %v749_v22 }
  0x88   :  { %791 = vmatpush1.bf16.msra.mxu1 %v749_v22  ;;  %752 = vmatprep.subr.bf16.mxu0 %v751_v23  ;;  %v499_v22 = vld [vmem:[%s985_s3 + $0x30] sm:$0xff] }
  0x89   :  { %776 = vmatprep.subr.bf16.mxu1 %v751_v23 }
  0x8b   :  { %754 = vmatpush1.bf16.msra.mxu0 %v753_v28 }
  0x8c   :  { %792 = vmatpush1.bf16.msra.mxu1 %v753_v28  ;;  %756 = vmatprep.subr.bf16.mxu0 %v755_v29 }
  0x8d   :  { %777 = vmatprep.subr.bf16.mxu1 %v755_v29 }
  0x8f   :  { %758 = vmatpush1.bf16.msra.mxu0 %v757_v34 }
  0x90   :  { %793 = vmatpush1.bf16.msra.mxu1 %v757_v34  ;;  %760 = vmatprep.subr.bf16.mxu0 %v759_v35 }
  0x91   :  { %778 = vmatprep.subr.bf16.mxu1 %v759_v35 }
  0x93   :  { %762 = vmatpush1.bf16.msra.mxu0 %v761_v38 }
  0x94   :  { %794 = vmatpush1.bf16.msra.mxu1 %v761_v38 }
  0x96   :  { %481 = vmatmul.mubr.f32.vlgmr.msra.gmra.mrb[4].mxu0 %v882_v8  ;;  %v238_v8 = vsub.s32 1, %v899_v16 }
  0x97   :  { %487 = vmatmul.mubr.f32.vlgmr.msra.gmra.mrb[4].mxu1 %v892_v18  ;;  %v246_v18 = vsub.s32 3, %v899_v16 }
  0x98   :  { %v239_v49 = vrot.slane %v905_v41, %v238_v8 }
  0x99   :  { %v247_v50 = vrot.slane %v905_v41, %v246_v18 }
 0x129   :  { %v328_v51 = vpop.f32.mrb[0].mxu0 }
 0x12a   :  { %v329_v55 = vadd.f32 %v328_v51, %v235_v45  ;;  %v405_v56 = vpop.f32.mrb[0].mxu1  ;;  %v330_v58 = vpop.f32.mrb[1].mxu0 }
 0x12b   :  { %v406_v60 = vadd.f32 %v405_v56, %v243_v47  ;;  %v331_v61 = vadd.f32 %v330_v58, %v239_v49  ;;  %v407_v62 = vpop.f32.mrb[1].mxu1 }
 0x12c   :  { %v522_v0 = vmul.f32 %v493_v52, %v329_v55  ;;  %v527_v1 = vmul.f32 %v494_v46, %v329_v55  ;;  %v408_v2 = vadd.f32 %v407_v62, %v247_v50 }
 0x12d   :  { %v538_v4 = vmul.f32 %v495_v57, %v406_v60  ;;  %v543_v5 = vmul.f32 %v496_v48, %v406_v60  ;;  %v523_v6 = vmul.f32 %v493_v52, %v331_v61  ;;  %v526_v7 = vmul.f32 %v506_v53, %v331_v61  ;;  %v334_v9 = vpop.f32.mrb[2].mxu0 }
 0x12e   :  { %v539_v11 = vmul.f32 %v495_v57, %v408_v2  ;;  %v542_v12 = vmul.f32 %v516_v59, %v408_v2  ;;  %v335_v13 = vadd.f32 %v334_v9, %v235_v45  ;;  %v411_v14 = vpop.f32.mrb[2].mxu1  ;;  %v336_v15 = vpop.f32.mrb[3].mxu0 }
 0x12f   :  { %v530_v19 = vadd.f32 %v526_v7, %v522_v0  ;;  %v531_v20 = vadd.f32 %v527_v1, %v523_v6  ;;  %v412_v21 = vadd.f32 %v411_v14, %v243_v47  ;;  %v337_v23 = vadd.f32 %v336_v15, %v239_v49  ;;  %v413_v24 = vpop.f32.mrb[3].mxu1 }
 0x130   :  { %v546_v25 = vadd.f32 %v542_v12, %v538_v4  ;;  %v547_v26 = vadd.f32 %v543_v5, %v539_v11  ;;  %v524_v27 = vmul.f32 %v497_v10, %v335_v13  ;;  %v529_v28 = vmul.f32 %v498_v54, %v335_v13 }
 0x131   :  { %534 = vst [vmem:[%s986_s4] sm:$0xff] %v530_v19  ;;  %535 = vst [vmem:[%s986_s4 + $0x8] sm:$0xff] %v531_v20  ;;  %v525_v29 = vmul.f32 %v497_v10, %v337_v23  ;;  %v528_v30 = vmul.f32 %v507_v3, %v337_v23  ;;  %v540_v31 = vmul.f32 %v499_v22, %v412_v21 }
 0x132   :  { %550 = vst [vmem:[%s987_s5] sm:$0xff] %v546_v25  ;;  %551 = vst [vmem:[%s987_s5 + $0x8] sm:$0xff] %v547_v26  ;;  %v545_v32 = vmul.f32 %v500_v63, %v412_v21  ;;  %v414_v33 = vadd.f32 %v413_v24, %v247_v50 }
 0x133   :  { %v532_v34 = vadd.f32 %v528_v30, %v524_v27  ;;  %v533_v35 = vadd.f32 %v529_v28, %v525_v29 }
 0x134   :  { %v541_v36 = vmul.f32 %v499_v22, %v414_v33  ;;  %v544_v37 = vmul.f32 %v517_v17, %v414_v33 }
 0x135   :  { %536 = vst [vmem:[%s986_s4 + $0x10] sm:$0xff] %v532_v34  ;;  %537 = vst [vmem:[%s986_s4 + $0x18] sm:$0xff] %v533_v35 }
 0x136   :  { %v548_v38 = vadd.f32 %v544_v37, %v540_v31  ;;  %v549_v39 = vadd.f32 %v545_v32, %v541_v36 }
 0x138   :  { %552 = vst [vmem:[%s987_s5 + $0x10] sm:$0xff] %v548_v38  ;;  %553 = vst [vmem:[%s987_s5 + $0x18] sm:$0xff] %v549_v39 }
 0x169   :  { %v482_v44 = vpop.f32.mrb[4].mxu0 }
 0x16a   :  { %v483_v8 = vadd.f32 %v482_v44, %v251_v43  ;;  %v488_v18 = vpop.f32.mrb[4].mxu1  ;;  %v484_v45 = vpop.f32.mrb[5].mxu0 }
 0x16b   :  { %v489_v46 = vadd.f32 %v488_v18, %v251_v43  ;;  %v485_v47 = vadd.f32 %v484_v45, %v908_v42  ;;  %v490_v48 = vpop.f32.mrb[5].mxu1 }
 0x16c   :  { %554 = vst [vmem:[%s988_s6] sm:$0xff] %v483_v8  ;;  %v491_v49 = vadd.f32 %v490_v48, %v908_v42 }
 0x16d   :  { %556 = vst [vmem:[%s988_s6 + $0x10] sm:$0xff] %v489_v46  ;;  %555 = vst [vmem:[%s988_s6 + $0x8] sm:$0xff] %v485_v47 }
 0x16e   :  { %557 = vst [vmem:[%s988_s6 + $0x18] sm:$0xff] %v491_v49 }
 0x16f   :  { %570 = vsyncpa [#allocation3], 1 }

</bundles_post_ra>
